<compile_context>
chip_gen: v5e
topology: v5e:2x2
jax: 0.10.0
libtpu: 0.0.40
codegen_flags: <defaults>
</compile_context>

<pallas_src>
import jax
import jax.numpy as jnp
from jax.experimental import pallas as pl
from jax.experimental.pallas import tpu as pltpu

_LANES = 128
_SUBLANE_MULT = 32          # safe second-minor multiple for 32/16/8-bit dtypes
_VEC_MULT = 8 * _LANES      # safe 1-D block granularity


def _mish_kernel(x_ref, o_ref):
    x = x_ref[...].astype(jnp.float32)
    u = jnp.exp(-jnp.abs(x))                 # in (0, 1], never overflows
    u2 = u * u
    pos = x >= 0.0
    num = jnp.where(pos, 1.0, u2) + 2.0 * u            # tanh(sp) numerator
    den = num + jnp.where(pos, 2.0 * u2, 2.0)          # denominator, >= 1
    r = pl.reciprocal(den, approx=True)
    r = r * (2.0 - den * r)   # single Newton step -> ~24-bit reciprocal
    o_ref[...] = (x * num * r).astype(o_ref.dtype)


def _round_up(a: int, m: int) -> int:
    return ((a + m - 1) // m) * m


def _vmem_capacity_bytes() -> int:
    """Physical per-core VMEM, with a conservative (v7x) fallback."""
    try:
        cap = getattr(pltpu.get_tpu_info(), "vmem_capacity_bytes", None)
        if cap:
            return int(cap)
    except Exception:
        pass
    return 64 << 20


def mish(x: jax.Array, *, block_bytes: int | None = None) -> jax.Array:
    """Elementwise Mish via a Pallas TPU kernel. Works for any shape/float dtype."""
    orig_shape = x.shape
    orig_dtype = x.dtype
    n = x.size
    if n == 0:
        return x

    itemsize = jnp.dtype(orig_dtype).itemsize
    vmem_cap = _vmem_capacity_bytes()
    if block_bytes is None:
        # 8 MiB blocks on 128-MiB-VMEM chips (v5e/v6e), 6 MiB on v7x (64 MiB).
        block_bytes = (8 << 20) if vmem_cap >= (96 << 20) else (6 << 20)
    # Resident footprint ~= 4x block (in + out, each double-buffered by the
    # default BlockSpec pipeline) + headroom.  Stays under physical VMEM on
    # all generations; explicitly raises the small scoped defaults.
    vmem_limit = min(4 * block_bytes + (16 << 20),
                     max(vmem_cap - (8 << 20), 16 << 20))
    cparams = pltpu.CompilerParams(
        dimension_semantics=("parallel",),   # shard row axis across v7x TCs
        vmem_limit_bytes=int(vmem_limit),
    )
    # TODO(synk): native bf16 compute path on v6e/v7x (loads/stores are already
    # bf16-width; compute is kept in f32 here for accuracy/simplicity).

    flat = x.reshape(-1)

    if n % _LANES == 0:
        # --- Common case: lane-dense (rows, 128) slab, zero copies. ---
        rows = n // _LANES
        total_bytes = n * itemsize
        br = max(1, block_bytes // (_LANES * itemsize))
        if total_bytes >= (8 << 20):
            # Keep >= ~8 grid steps so both v7x TCs get work and the DMA
            # pipeline stays deep (blocks remain >= ~1 MiB).
            br = min(br, pl.cdiv(rows, 8))
        br = min(_round_up(max(br, _SUBLANE_MULT), _SUBLANE_MULT),
                 _round_up(rows, _SUBLANE_MULT))
        grid = (pl.cdiv(rows, br),)   # ragged last block masked by Pallas

        out2d = pl.pallas_call(
            _mish_kernel,
            out_shape=jax.ShapeDtypeStruct((rows, _LANES), orig_dtype),
            grid_spec=pltpu.PrefetchScalarGridSpec(
                num_scalar_prefetch=0,
                grid=grid,
                in_specs=[pl.BlockSpec((br, _LANES), lambda i: (i, 0))],
                out_specs=pl.BlockSpec((br, _LANES), lambda i: (i, 0)),
            ),
            compiler_params=cparams,
        )(flat.reshape(rows, _LANES))
        return out2d.reshape(orig_shape)

    # --- Ragged element count: grid the flat 1-D array directly.  The tail
    # block is masked by Pallas, so no jnp.pad / slice HBM passes are needed.
    blk = max(1, block_bytes // itemsize)
    blk = min(_round_up(max(blk, _VEC_MULT), _VEC_MULT),
              _round_up(n, _VEC_MULT))
    grid = (pl.cdiv(n, blk),)
    out_flat = pl.pallas_call(
        _mish_kernel,
        out_shape=jax.ShapeDtypeStruct((n,), orig_dtype),
        grid_spec=pltpu.PrefetchScalarGridSpec(
            num_scalar_prefetch=0,
            grid=grid,
            in_specs=[pl.BlockSpec((blk,), lambda i: (i,))],
            out_specs=pl.BlockSpec((blk,), lambda i: (i,)),
        ),
        compiler_params=cparams,
    )(flat)
    return out_flat.reshape(orig_shape)


def _mish_ref(x):
    xf = x.astype(jnp.float32)
    sp = jnp.logaddexp(xf, 0.0)  # softplus
    return (xf * jnp.tanh(sp)).astype(x.dtype)


if __name__ == "__main__":
    key = jax.random.PRNGKey(0)
    x = jax.random.normal(key, (2, 4, 16, 16), dtype=jnp.float32)  # NCHW

    y = jax.block_until_ready(mish(x))

    y_ref = _mish_ref(x)
    assert y.shape == x.shape and y.dtype == x.dtype
    assert jnp.allclose(y, y_ref, atol=1e-5, rtol=1e-5), "mismatch vs reference"

    print("KERNEL_OK")
</pallas_src>

<mosaic_0001>
module attributes {stable_mosaic.version = 11 : i64} {
  func.func @_mish_kernel(%arg0: i32, %arg1: memref<32x128xf32, #tpu.memory_space<vmem>>, %arg2: memref<32x128xf32, #tpu.memory_space<vmem>>) attributes {dimension_semantics = [#tpu.dimension_semantics<parallel>], iteration_bounds = array<i64: 1>, scalar_prefetch = 0 : i64, scratch_operands = 0 : i64, tpu.core_type = #tpu.core_type<tc>, window_params = [{transform_indices = @transform_0, window_bounds = array<i64: 32, 128>}, {transform_indices = @transform_1, window_bounds = array<i64: 32, 128>}]} {
    %c0 = arith.constant 0 : index
    %c0_0 = arith.constant 0 : index
    %0 = vector.load %arg1[%c0, %c0_0] : memref<32x128xf32, #tpu.memory_space<vmem>>, vector<32x128xf32>
    %1 = math.absf %0 : vector<32x128xf32>
    %cst = arith.constant 0.000000e+00 : f32
    %2 = vector.broadcast %cst : f32 to vector<32x128xf32>
    %3 = arith.subf %2, %1 : vector<32x128xf32>
    %4 = math.exp %3 : vector<32x128xf32>
    %5 = arith.mulf %4, %4 : vector<32x128xf32>
    %cst_1 = arith.constant 0.000000e+00 : f32
    %6 = vector.broadcast %cst_1 : f32 to vector<32x128xf32>
    %7 = arith.cmpf oge, %0, %6 : vector<32x128xf32>
    %cst_2 = arith.constant 1.000000e+00 : f32
    %8 = vector.broadcast %cst_2 : f32 to vector<32x128xf32>
    %9 = arith.select %7, %8, %5 : vector<32x128xi1>, vector<32x128xf32>
    %cst_3 = arith.constant 2.000000e+00 : f32
    %10 = vector.broadcast %cst_3 : f32 to vector<32x128xf32>
    %11 = arith.mulf %10, %4 : vector<32x128xf32>
    %12 = arith.addf %9, %11 : vector<32x128xf32>
    %cst_4 = arith.constant 2.000000e+00 : f32
    %13 = vector.broadcast %cst_4 : f32 to vector<32x128xf32>
    %14 = arith.mulf %13, %5 : vector<32x128xf32>
    %cst_5 = arith.constant 2.000000e+00 : f32
    %15 = vector.broadcast %cst_5 : f32 to vector<32x128xf32>
    %16 = arith.select %7, %14, %15 : vector<32x128xi1>, vector<32x128xf32>
    %17 = arith.addf %12, %16 : vector<32x128xf32>
    %18 = tpu.reciprocal %17 {approx = true} : vector<32x128xf32> -> vector<32x128xf32>
    %19 = arith.mulf %17, %18 : vector<32x128xf32>
    %cst_6 = arith.constant 2.000000e+00 : f32
    %20 = vector.broadcast %cst_6 : f32 to vector<32x128xf32>
    %21 = arith.subf %20, %19 : vector<32x128xf32>
    %22 = arith.mulf %18, %21 : vector<32x128xf32>
    %23 = arith.mulf %0, %12 : vector<32x128xf32>
    %24 = arith.mulf %23, %22 : vector<32x128xf32>
    %c0_7 = arith.constant 0 : index
    %c0_8 = arith.constant 0 : index
    %25 = vector.load %arg2[%c0_7, %c0_8] : memref<32x128xf32, #tpu.memory_space<vmem>>, vector<32x128xf32>
    tpu.vector_store %arg2[%c0_7, %c0_8], %24 {strides = array<i32>} : memref<32x128xf32, #tpu.memory_space<vmem>>, vector<32x128xf32>,
    return
  }
  func.func @transform_0(%arg0: i32) -> (i32, i32) {
    %c0_i32 = arith.constant 0 : i32
    %c0_i32_0 = arith.constant 0 : i32
    return %arg0, %c0_i32 : i32, i32
  }
  func.func @transform_1(%arg0: i32) -> (i32, i32) {
    %c0_i32 = arith.constant 0 : i32
    %c0_i32_0 = arith.constant 0 : i32
    return %arg0, %c0_i32 : i32, i32
  }
}

</mosaic_0001>

<bundles_post_ra>
// kernel: tpu_custom_call.1
= control target key start
LH: loop header
LB: loop body
LE: loop exit
PB: predicated region body
PF: predicated region fallthrough
CT: control target
= control target key end

     0   :  { %6 = vsyncpa [#allocation3], 0  ;;  %s258_s0 = inlined_call_operand.hbm [shape: f32[16,128], index: 0, kind: input, shape index: {}]   ;;  %s259_s1 = inlined_call_operand.hbm [shape: f32[16,128], index: 1, kind: output, shape index: {}]  }
   0x1   :  { %7 = vsyncpa [#allocation4], 0 }
   0x2   :  { %11 = vsyncadd [#allocation3], 256  ;;  %s12_s8 = sshll.u32 %s258_s0, 4  ;;  %s196_s9 = smov [#allocation2]   ;;  %s13_s8 = int_to_ptr.hbm [resolvable:$true] %s12_s8 }
   0x3   :  { %s14_s10 = sshll.u32 %s196_s9, 4  ;;  %s197_s11 = smov 128   ;;  %s15_s10 = int_to_ptr.vmem [resolvable:$true] %s14_s10 }
   0x4   :  { %s198_s12 = smov 8  }
   0x5   :  { %20 = dma.hbm_to_vmem [thread:$0]  %s13_s8, 256, %s15_s10, [#allocation3], %s197_s11, %s197_s11, %s198_s12  }
   0x6   :  { %192 = dma.done.wait [#allocation3], 512  }
   0x7   :  { %193 = vsyncadd [#allocation3], 4294966784  ;;  %v216_v0 = vld [vmem:[#allocation2] sm:$0xff]  ;;  %v218_v1 = vld [vmem:[#allocation2 + $0x8] sm:$0xff] }
   0x8   :  { %v220_v2 = vld [vmem:[#allocation2 + $0x10] sm:$0xff]  ;;  %v29_v3 = vand.u32 2147483647, %v216_v0  ;;  %v30_v4 = vand.u32 2147483647, %v218_v1  ;;  %v225_v6 = vld [vmem:[#allocation2 + $0x18] sm:$0xff] }
   0x9   :  { %v31_v5 = vand.u32 2147483647, %v220_v2  ;;  %v32_v9 = vand.u32 2147483647, %v225_v6  ;;  %vm49_vm0 = vcmp.ge.f32.partialorder %v216_v0, 0.0  ;;  %vm50_vm1 = vcmp.ge.f32.partialorder %v218_v1, 0.0 }
   0xa   :  { %v33_v7 = vsub.f32 0.0, %v29_v3  ;;  %v34_v8 = vsub.f32 0.0, %v30_v4  ;;  %vm51_vm2 = vcmp.ge.f32.partialorder %v220_v2, 0.0  ;;  %vm52_vm3 = vcmp.ge.f32.partialorder %v225_v6, 0.0 }
   0xb   :  { %v35_v10 = vsub.f32 0.0, %v31_v5  ;;  %v36_v13 = vsub.f32 0.0, %v32_v9 }
   0xc   :  { %v37_v11 = vmul.f32 1.442695, %v33_v7  ;;  %v39_v12 = vmul.f32 1.442695, %v34_v8 }
   0xd   :  { %v41_v14 = vmul.f32 1.442695, %v35_v10  ;;  %v43_v15 = vmul.f32 1.442695, %v36_v13 }
   0xe   :  { %128 = vpow2.f32 %v37_v11 }
   0xf   :  { %130 = vpow2.f32 %v39_v12 }
  0x10   :  { %132 = vpow2.f32 %v41_v14 }
  0x11   :  { %134 = vpow2.f32 %v43_v15 }
  0x14   :  { %v129_v16 = vpop.eup %128 }
  0x15   :  { %v131_v17 = vpop.eup %130  ;;  %v45_v18 = vmul.f32 %v129_v16, %v129_v16  ;;  %v57_v19 = vmul.f32 2.0, %v129_v16 }
  0x16   :  { %v133_v20 = vpop.eup %132  ;;  %v46_v21 = vmul.f32 %v131_v17, %v131_v17  ;;  %v58_v22 = vmul.f32 2.0, %v131_v17 }
  0x17   :  { %v135_v23 = vpop.eup %134  ;;  %v53_v24 = vsel %vm49_vm0, 1.0, %v45_v18  ;;  %v65_v25 = vmul.f32 2.0, %v45_v18  ;;  %v47_v26 = vmul.f32 %v133_v20, %v133_v20  ;;  %v59_v27 = vmul.f32 2.0, %v133_v20 }
  0x18   :  { %v61_v28 = vadd.f32 %v57_v19, %v53_v24  ;;  %v54_v29 = vsel %vm50_vm1, 1.0, %v46_v21  ;;  %v66_v30 = vmul.f32 2.0, %v46_v21  ;;  %v48_v31 = vmul.f32 %v135_v23, %v135_v23 }
  0x19   :  { %v69_v32 = vsel %vm49_vm0, %v65_v25, 2.0  ;;  %v62_v33 = vadd.f32 %v58_v22, %v54_v29  ;;  %v55_v34 = vsel %vm51_vm2, 1.0, %v47_v26  ;;  %v67_v35 = vmul.f32 2.0, %v47_v26 }
  0x1a   :  { %v73_v36 = vadd.f32 %v69_v32, %v61_v28  ;;  %v70_v37 = vsel %vm50_vm1, %v66_v30, 2.0  ;;  %v63_v38 = vadd.f32 %v59_v27, %v55_v34  ;;  %v56_v41 = vsel %vm52_vm3, 1.0, %v48_v31 }
  0x1b   :  { %v74_v39 = vadd.f32 %v70_v37, %v62_v33  ;;  %v71_v40 = vsel %vm51_vm2, %v67_v35, 2.0  ;;  %v60_v43 = vmul.f32 2.0, %v135_v23  ;;  %v68_v44 = vmul.f32 2.0, %v48_v31 }
  0x1c   :  { %136 = vrcp.f32 %v73_v36  ;;  %v75_v42 = vadd.f32 %v71_v40, %v63_v38  ;;  %v93_v54 = vmul.f32 %v61_v28, %v216_v0  ;;  %v94_v57 = vmul.f32 %v62_v33, %v218_v1 }
  0x1d   :  { %138 = vrcp.f32 %v74_v39  ;;  %v64_v45 = vadd.f32 %v60_v43, %v56_v41  ;;  %v72_v46 = vsel %vm52_vm3, %v68_v44, 2.0  ;;  %v95_v60 = vmul.f32 %v63_v38, %v220_v2 }
  0x1e   :  { %140 = vrcp.f32 %v75_v42 }
  0x1f   :  { %v76_v47 = vadd.f32 %v72_v46, %v64_v45  ;;  %v96_v9 = vmul.f32 %v64_v45, %v225_v6 }
  0x21   :  { %142 = vrcp.f32 %v76_v47 }
  0x22   :  { %v137_v48 = vpop.eup %136 }
  0x23   :  { %v139_v49 = vpop.eup %138  ;;  %v81_v50 = vmul.f32 %v137_v48, %v73_v36 }
  0x24   :  { %v141_v51 = vpop.eup %140  ;;  %v82_v52 = vmul.f32 %v139_v49, %v74_v39 }
  0x25   :  { %v85_v53 = vsub.f32 2.0, %v81_v50  ;;  %v83_v55 = vmul.f32 %v141_v51, %v75_v42 }
  0x26   :  { %v86_v56 = vsub.f32 2.0, %v82_v52 }
  0x27   :  { %v89_v58 = vmul.f32 %v137_v48, %v85_v53  ;;  %v87_v59 = vsub.f32 2.0, %v83_v55  ;;  %v143_v61 = vpop.eup %142 }
  0x28   :  { %v90_v62 = vmul.f32 %v139_v49, %v86_v56  ;;  %v84_v4 = vmul.f32 %v143_v61, %v76_v47 }
  0x29   :  { %v97_v63 = vmul.f32 %v93_v54, %v89_v58  ;;  %v91_v3 = vmul.f32 %v141_v51, %v87_v59 }
  0x2a   :  { %v98_v5 = vmul.f32 %v94_v57, %v90_v62  ;;  %v88_v8 = vsub.f32 2.0, %v84_v4 }
  0x2b   :  { %101 = vst [vmem:[#allocation5] sm:$0xff] %v97_v63  ;;  %v99_v7 = vmul.f32 %v95_v60, %v91_v3 }
  0x2c   :  { %102 = vst [vmem:[#allocation5 + $0x8] sm:$0xff] %v98_v5  ;;  %v92_v0 = vmul.f32 %v143_v61, %v88_v8 }
  0x2d   :  { %103 = vst [vmem:[#allocation5 + $0x10] sm:$0xff] %v99_v7 }
  0x2e   :  { %v100_v10 = vmul.f32 %v96_v9, %v92_v0 }
  0x30   :  { %104 = vst [vmem:[#allocation5 + $0x18] sm:$0xff] %v100_v10 }
  0x31   :  { %108 = vsyncadd [#allocation4], 256  ;;  %s111_s14 = sshll.u32 %s259_s1, 4  ;;  %s199_s15 = smov [#allocation5]   ;;  %s112_s14 = int_to_ptr.hbm [resolvable:$true] %s111_s14 }
  0x32   :  { %s109_s16 = sshll.u32 %s199_s15, 4  ;;  %s110_s16 = int_to_ptr.vmem [resolvable:$true] %s109_s16 }
  0x33   :  { %117 = dma.vmem_to_hbm [thread:$0]  %s110_s16, 256, %s112_s14, [#allocation4], %s197_s11, %s197_s11, %s198_s12  }
  0x34   :  { %194 = dma.done.wait [#allocation4], 512  }
  0x35   :  { %195 = vsyncadd [#allocation4], 4294966784 }
  0x36   :  { %122 = vsyncpa [#allocation3], 1 }
  0x37   :  { %123 = vsyncpa [#allocation4], 1 }

</bundles_post_ra>
